<compile_context>
chip_gen: v7x
topology: tpu7x:2x2x1
jax: 0.10.0
libtpu: 0.0.40
codegen_flags: <defaults>
</compile_context>

<pallas_src>
import functools
import math

import jax
import jax.numpy as jnp
from jax import lax
from jax.experimental import pallas as pl
from jax.experimental.pallas import tpu as pltpu

# ---- synthetic "config" constants (PIDNet defaults) -------------------------
IGNORE_LABEL = 255
BALANCE_WEIGHTS = (0.4, 1.0)        # sem_loss weights for [P head, I head]
SB_WEIGHTS = 0.5                    # sem_loss weight for the boundary-gated call
BD_COEFF = 20.0                     # BoundaryLoss coeff_bce
NUM_ACC = 16                        # accumulator rows (11 used, padded to 16)
SB_LOGIT_THRESH = math.log(4.0)     # sigmoid(d) > 0.8  <=>  d > log(4)


def _vmem_capacity_bytes():
    """Per-core VMEM capacity; conservative v7x fallback if unqueryable."""
    try:
        cap = getattr(pltpu.get_tpu_info(), "vmem_capacity_bytes", None)
        if cap:
            return int(cap)
    except Exception:
        pass
    return 64 << 20


def _est_vmem_bytes(tm, cin, c, cout):
    """Estimate of the per-tile VMEM working set (double-buffered IO + temps)."""
    io = tm * (2 * 2 * cin          # x bf16, 2 buffers
               + 2 * 1              # labels int8, 2 buffers
               + 2 * 2              # bd_gt bf16, 2 buffers
               + 2 * 2 * 2 * c)     # P + I bf16 outputs, 2 buffers each
    scratch = 4 * NUM_ACC * tm      # f32 accumulator scratch
    # f32 intermediates: logits (Cout,TM), onehot + exp temps (~3C,TM),
    # ~16 single-row (1,TM) temporaries (ce/bce/masks/...)
    work = 4 * tm * (cout + 3 * c + 16)
    fixed = 4 * cout * (cin + 1) + (1 << 20)
    return io + scratch + work + fixed


def _pick_tile(hw, max_tile, budget_bytes, cin, c, cout):
    """Largest multiple-of-128 divisor of hw (<= max_tile) fitting the budget."""
    best = None
    t = 128
    while t <= min(hw, max_tile):
        if hw % t == 0 and _est_vmem_bytes(t, cin, c, cout) <= budget_bytes:
            best = t
        t += 128
    if best is None:
        # TODO(synk): no masked handling of ragged pixel tiles; H*W must be a
        # multiple of 128 for this kernel.
        raise ValueError("H*W (per shard) must be a multiple of 128")
    return best


def _fullmodel_kernel(x_ref, w_ref, b_ref, lab_ref, bd_ref,
                      p_ref, i_ref, partial_ref, acc_scr, *, num_classes):
    """One (batch n, shard s, pixel-tile t) step: fused heads + loss partials."""
    t = pl.program_id(2)
    C = num_classes
    TM = x_ref.shape[-1]

    @pl.when(t == 0)
    def _():
        acc_scr[...] = jnp.zeros_like(acc_scr)

    # ---- model: fused 1x1-conv heads on the MXU (bf16 x bf16 -> f32) -------
    # bias is a broadcasted add; never materialized as a (Cout, TM) tensor.
    logits = jnp.dot(w_ref[...], x_ref[0],
                     preferred_element_type=jnp.float32) + b_ref[...]

    p = logits[0:C, :]                                  # outputs[0]  (P head)
    i_log = logits[C:2 * C, :]                          # outputs[-2] (I head)
    d = logits[2 * C:2 * C + 1, :]                      # outputs[-1] (boundary)

    # Only the P and I heads go back to HBM; d is consumed in-kernel.
    p_ref[0] = p.astype(p_ref.dtype)
    i_ref[0] = i_log.astype(i_ref.dtype)

    # narrow HBM streams widened in-kernel (int8 bit-pattern -> unsigned value)
    lab = lab_ref[0].astype(jnp.int32) & 255            # (1, TM)
    bd = bd_ref[0].astype(jnp.float32)                  # (1, TM)

    cls_iota = lax.broadcasted_iota(jnp.int32, (C, TM), 0)
    onehot = (cls_iota == lab).astype(jnp.float32)      # (C, TM)

    def ce_and_max(lg):                                 # per-pixel CE + row max
        m = jnp.max(lg, axis=0, keepdims=True)
        lse = m + jnp.log(jnp.sum(jnp.exp(lg - m), axis=0, keepdims=True))
        picked = jnp.sum(lg * onehot, axis=0, keepdims=True)
        return lse - picked, m

    valid = (lab != IGNORE_LABEL)
    validf = valid.astype(jnp.float32)

    ce_p, _ = ce_and_max(p)
    ce_i, i_max = ce_and_max(i_log)                     # reuse max for argmax

    # ---- pixel accuracy on outputs[-2] (first argmax index, torch.max) -----
    preds = jnp.min(jnp.where(i_log >= i_max, cls_iota, C),
                    axis=0, keepdims=True)
    acc_valid = (lab >= 0).astype(jnp.float32)          # matches PyTorch quirk
    correct = (preds == lab).astype(jnp.float32) * acc_valid

    # ---- boundary loss: class-balanced BCE-with-logits partials ------------
    bce = jnp.maximum(d, 0.0) - d * bd + jnp.log(1.0 + jnp.exp(-jnp.abs(d)))
    pos = (bd == 1.0).astype(jnp.float32)
    neg = (bd == 0.0).astype(jnp.float32)

    # ---- boundary-gated semantic loss (loss_sb): logit-space gate ----------
    sb_valid = jnp.where(d > SB_LOGIT_THRESH, validf, 0.0)

    # Elementwise accumulation into the (NUM_ACC, TM) scratch; the cross-lane
    # reductions happen only once per (batch, shard) at the last pixel tile.
    rows = (
        ce_p * validf,      # 0: sum CE(P head) over valid
        ce_i * validf,      # 1: sum CE(I head) over valid
        validf,             # 2: n_valid
        correct,            # 3: acc_sum
        acc_valid,          # 4: pixel_sum
        bce * pos,          # 5: sum BCE over positive boundary pixels
        bce * neg,          # 6: sum BCE over negative boundary pixels
        pos,                # 7: pos_num
        neg,                # 8: neg_num
        ce_i * sb_valid,    # 9: sum CE(I head) over boundary-gated valid
        sb_valid,           # 10: boundary-gated valid count
    )
    for k, r in enumerate(rows):
        acc_scr[k:k + 1, :] = acc_scr[k:k + 1, :] + r

    @pl.when(t == pl.num_programs(2) - 1)
    def _():
        sums = jnp.sum(acc_scr[...], axis=1, keepdims=True)     # (NUM_ACC, 1)
        partial_ref[...] = jnp.broadcast_to(sums[None, None],
                                            (1, 1, NUM_ACC, 128))


def full_model_forward(x_nchw, labels, bd_gt, params, *, num_classes,
                       max_tile_rows=32768, out_dtype=jnp.bfloat16):
    """JAX/Pallas equivalent of FullModel.forward."""
    N, Cin, H, W = x_nchw.shape
    HW = H * W
    C = num_classes
    Cout = 2 * C + 1

    cap = _vmem_capacity_bytes()
    budget = int(0.45 * cap)                            # working-set budget

    # Optional pixel-shard parallel axis: keeps both TensorCores busy on dual-TC
    # chips (v7x) when the batch axis alone cannot be split.
    S = 2 if (N == 1 and HW % 256 == 0) else 1
    HWs = HW // S
    TM = _pick_tile(HWs, max_tile_rows, budget, Cin, C, Cout)
    n_t = HWs // TM

    # Channel-major layout: plain reshapes, no NCHW<->NHWC HBM round trips.
    # Narrow input streams: labels int8 (bit pattern, decoded & 0xFF in-kernel),
    # bd_gt bf16 (exactly represents the binary targets).
    x = x_nchw.reshape(N, Cin, HW).astype(jnp.bfloat16)
    lab = labels.reshape(N, 1, HW).astype(jnp.int8)
    bd = bd_gt.reshape(N, 1, HW).astype(jnp.bfloat16)
    wt = params["w"].astype(jnp.bfloat16)               # (Cout, Cin) conv layout
    bias = params["b"].astype(jnp.float32)              # (Cout, 1)

    est = _est_vmem_bytes(TM, Cin, C, Cout)
    vmem_limit = int(min(max(2 * est, 32 << 20), int(0.75 * cap)))

    kernel = functools.partial(_fullmodel_kernel, num_classes=C)
    grid = (N, S, n_t)

    p_flat, i_flat, partials = pl.pallas_call(
        kernel,
        out_shape=(
            jax.ShapeDtypeStruct((N, C, HW), out_dtype),            # P head
            jax.ShapeDtypeStruct((N, C, HW), out_dtype),            # I head
            jax.ShapeDtypeStruct((N, S, NUM_ACC, 128), jnp.float32),  # partials
        ),
        grid_spec=pltpu.PrefetchScalarGridSpec(
            num_scalar_prefetch=0,
            grid=grid,
            in_specs=[
                pl.BlockSpec((1, Cin, TM), lambda n, s, t: (n, 0, s * n_t + t)),
                pl.BlockSpec((Cout, Cin), lambda n, s, t: (0, 0)),    # fused W
                pl.BlockSpec((Cout, 1), lambda n, s, t: (0, 0)),      # fused b
                pl.BlockSpec((1, 1, TM), lambda n, s, t: (n, 0, s * n_t + t)),
                pl.BlockSpec((1, 1, TM), lambda n, s, t: (n, 0, s * n_t + t)),
            ],
            out_specs=(
                pl.BlockSpec((1, C, TM), lambda n, s, t: (n, 0, s * n_t + t)),
                pl.BlockSpec((1, C, TM), lambda n, s, t: (n, 0, s * n_t + t)),
                # per-(batch, shard) resident accumulator (constant over t)
                pl.BlockSpec((1, 1, NUM_ACC, 128), lambda n, s, t: (n, s, 0, 0)),
            ),
            scratch_shapes=[pltpu.VMEM((NUM_ACC, TM), jnp.float32)],
        ),
        compiler_params=pltpu.CompilerParams(
            dimension_semantics=("parallel", "parallel", "arbitrary"),
            vmem_limit_bytes=vmem_limit),
    )(x, wt, bias, lab, bd)

    # all 128 lanes of each accumulator row are identical -> take lane 0
    accs = jnp.sum(partials[:, :, :, 0], axis=(0, 1))   # (NUM_ACC,)

    # ---- assemble scalars exactly as FullModel.forward does ----------------
    # (jnp.maximum guards only kick in for empty sets, where the PyTorch
    #  reference would produce NaN; numerator is 0 there so we return 0.)
    R = jnp.float32(N * HW)
    n_valid = jnp.maximum(accs[2], 1.0)
    ce_p_mean = accs[0] / n_valid
    ce_i_mean = accs[1] / n_valid
    loss_s = BALANCE_WEIGHTS[0] * ce_p_mean + BALANCE_WEIGHTS[1] * ce_i_mean

    acc = accs[3] / (accs[4] + 1e-10)                   # pixel_acc

    pos_num, neg_num = accs[7], accs[8]
    sum_num = jnp.maximum(pos_num + neg_num, 1.0)
    weighted_bce_sum = (neg_num / sum_num) * accs[5] + (pos_num / sum_num) * accs[6]
    loss_b = BD_COEFF * weighted_bce_sum / R            # bd_loss

    loss_sb = SB_WEIGHTS * (accs[9] / jnp.maximum(accs[10], 1.0))
    loss = loss_s + loss_b + loss_sb

    # outputs[:-1] in PyTorch NCHW convention: channel-major already -> reshape
    p_nchw = p_flat.reshape(N, C, H, W)
    i_nchw = i_flat.reshape(N, C, H, W)

    # TODO(synk): the F.interpolate(bilinear) branch is a no-op here because the
    # synthetic heads emit full-resolution maps (ph==h, pw==w).
    return loss[None], [p_nchw, i_nchw], acc, [loss_s, loss_b]


if __name__ == "__main__":
    key = jax.random.PRNGKey(0)
    N, Cin, H, W = 2, 4, 16, 16
    num_classes = 8
    Cout = 2 * num_classes + 1
    k1, k2, k3, k4, k5 = jax.random.split(key, 5)

    x = jax.random.normal(k1, (N, Cin, H, W), jnp.float32)
    labels = jax.random.randint(k2, (N, H, W), 0, num_classes).astype(jnp.int32)
    labels = jnp.where(jax.random.uniform(k3, (N, H, W)) < 0.1,
                       IGNORE_LABEL, labels)                    # some ignored px
    bd_gt = (jax.random.uniform(k4, (N, H, W)) < 0.2).astype(jnp.float32)

    # deterministic fused-head parameters in conv layout: W (Cout, Cin), b (Cout, 1)
    Wmat = 0.1 * jax.random.normal(k5, (Cout, Cin), jnp.float32)
    bvec = jnp.concatenate([jnp.zeros((2 * num_classes, 1), jnp.float32),
                            jnp.full((1, 1), 2.5, jnp.float32)], axis=0)

    out = full_model_forward(x, labels, bd_gt, {"w": Wmat, "b": bvec},
                             num_classes=num_classes)
    jax.block_until_ready(out)
    print("KERNEL_OK")
</pallas_src>

<mosaic_0001>
module attributes {stable_mosaic.version = 11 : i64} {
  func.func @_fullmodel_kernel(%arg0: i32, %arg1: i32, %arg2: i32, %arg3: memref<1x4x256xbf16, #tpu.memory_space<vmem>>, %arg4: memref<17x4xbf16, #tpu.memory_space<vmem>>, %arg5: memref<17x1xf32, #tpu.memory_space<vmem>>, %arg6: memref<1x1x256xi8, #tpu.memory_space<vmem>>, %arg7: memref<1x1x256xbf16, #tpu.memory_space<vmem>>, %arg8: memref<1x8x256xbf16, #tpu.memory_space<vmem>>, %arg9: memref<1x8x256xbf16, #tpu.memory_space<vmem>>, %arg10: memref<1x1x16x128xf32, #tpu.memory_space<vmem>>, %arg11: memref<16x256xf32, #tpu.memory_space<vmem>>) attributes {dimension_semantics = [#tpu.dimension_semantics<parallel>, #tpu.dimension_semantics<parallel>, #tpu.dimension_semantics<arbitrary>], iteration_bounds = array<i64: 2, 1, 1>, scalar_prefetch = 0 : i64, scratch_operands = 1 : i64, tpu.core_type = #tpu.core_type<tc>, window_params = [{transform_indices = @transform_0, window_bounds = array<i64: 1, 4, 256>}, {pipeline_mode = #tpu.pipeline_mode<synchronous>, transform_indices = @transform_1, window_bounds = array<i64: 17, 4>}, {pipeline_mode = #tpu.pipeline_mode<synchronous>, transform_indices = @transform_2, window_bounds = array<i64: 17, 1>}, {transform_indices = @transform_3, window_bounds = array<i64: 1, 1, 256>}, {transform_indices = @transform_4, window_bounds = array<i64: 1, 1, 256>}, {transform_indices = @transform_5, window_bounds = array<i64: 1, 8, 256>}, {transform_indices = @transform_6, window_bounds = array<i64: 1, 8, 256>}, {transform_indices = @transform_7, window_bounds = array<i64: 1, 1, 16, 128>}]} {
    %c0_i32 = arith.constant 0 : i32
    %0 = arith.cmpi eq, %arg2, %c0_i32 : i32
    %1 = arith.extui %0 : i1 to i32
    %c0_i32_0 = arith.constant 0 : i32
    %2 = arith.cmpi ne, %1, %c0_i32_0 : i32
    scf.if %2 {
      %cst_71 = arith.constant 0.000000e+00 : f32
      %143 = vector.broadcast %cst_71 : f32 to vector<16x256xf32>
      %c0_72 = arith.constant 0 : index
      %c0_73 = arith.constant 0 : index
      %144 = vector.load %arg11[%c0_72, %c0_73] : memref<16x256xf32, #tpu.memory_space<vmem>>, vector<16x256xf32>
      tpu.vector_store %arg11[%c0_72, %c0_73], %143 {strides = array<i32>} : memref<16x256xf32, #tpu.memory_space<vmem>>, vector<16x256xf32>,
    } else {
    }
    %c0 = arith.constant 0 : index
    %c0_1 = arith.constant 0 : index
    %3 = vector.load %arg4[%c0, %c0_1] : memref<17x4xbf16, #tpu.memory_space<vmem>>, vector<17x4xbf16>
    %c0_2 = arith.constant 0 : index
    %c0_3 = arith.constant 0 : index
    %c0_4 = arith.constant 0 : index
    %4 = vector.load %arg3[%c0_2, %c0_3, %c0_4] : memref<1x4x256xbf16, #tpu.memory_space<vmem>>, vector<1x4x256xbf16>
    %5 = vector.shape_cast %4 : vector<1x4x256xbf16> to vector<4x256xbf16>
    %cst = arith.constant dense<0.000000e+00> : vector<17x256xf32>
    %6 = tpu.matmul %3, %5, %cst {dimension_numbers = #tpu.dot_dimension_numbers<[1], [0], [0], [1], [0, 0, 1, 1], [], []>} : vector<17x4xbf16>, vector<4x256xbf16>, vector<17x256xf32> -> vector<17x256xf32>
    %c0_5 = arith.constant 0 : index
    %c0_6 = arith.constant 0 : index
    %7 = vector.load %arg5[%c0_5, %c0_6] : memref<17x1xf32, #tpu.memory_space<vmem>>, vector<17x1xf32>
    %8 = vector.broadcast %7 : vector<17x1xf32> to vector<17x256xf32>
    %9 = arith.addf %6, %8 : vector<17x256xf32>
    %10 = vector.extract_strided_slice %9 {offsets = [0, 0], sizes = [8, 256], strides = [1, 1]} : vector<17x256xf32> to vector<8x256xf32>
    %11 = vector.extract_strided_slice %9 {offsets = [8, 0], sizes = [8, 256], strides = [1, 1]} : vector<17x256xf32> to vector<8x256xf32>
    %12 = vector.extract_strided_slice %9 {offsets = [16, 0], sizes = [1, 256], strides = [1, 1]} : vector<17x256xf32> to vector<1x256xf32>
    %13 = arith.truncf %10 : vector<8x256xf32> to vector<8x256xbf16>
    %c0_7 = arith.constant 0 : index
    %c0_8 = arith.constant 0 : index
    %c0_9 = arith.constant 0 : index
    %14 = vector.load %arg8[%c0_7, %c0_8, %c0_9] : memref<1x8x256xbf16, #tpu.memory_space<vmem>>, vector<1x8x256xbf16>
    %15 = vector.shape_cast %14 : vector<1x8x256xbf16> to vector<8x256xbf16>
    %16 = vector.shape_cast %13 : vector<8x256xbf16> to vector<1x8x256xbf16>
    tpu.vector_store %arg8[%c0_7, %c0_8, %c0_9], %16 {strides = array<i32>} : memref<1x8x256xbf16, #tpu.memory_space<vmem>>, vector<1x8x256xbf16>,
    %17 = arith.truncf %11 : vector<8x256xf32> to vector<8x256xbf16>
    %c0_10 = arith.constant 0 : index
    %c0_11 = arith.constant 0 : index
    %c0_12 = arith.constant 0 : index
    %18 = vector.load %arg9[%c0_10, %c0_11, %c0_12] : memref<1x8x256xbf16, #tpu.memory_space<vmem>>, vector<1x8x256xbf16>
    %19 = vector.shape_cast %18 : vector<1x8x256xbf16> to vector<8x256xbf16>
    %20 = vector.shape_cast %17 : vector<8x256xbf16> to vector<1x8x256xbf16>
    tpu.vector_store %arg9[%c0_10, %c0_11, %c0_12], %20 {strides = array<i32>} : memref<1x8x256xbf16, #tpu.memory_space<vmem>>, vector<1x8x256xbf16>,
    %c0_13 = arith.constant 0 : index
    %c0_14 = arith.constant 0 : index
    %c0_15 = arith.constant 0 : index
    %21 = vector.load %arg6[%c0_13, %c0_14, %c0_15] : memref<1x1x256xi8, #tpu.memory_space<vmem>>, vector<1x1x256xi8>
    %22 = vector.shape_cast %21 : vector<1x1x256xi8> to vector<1x256xi8>
    %23 = arith.extsi %22 : vector<1x256xi8> to vector<1x256xi32>
    %c255_i32 = arith.constant 255 : i32
    %24 = vector.broadcast %c255_i32 : i32 to vector<1x256xi32>
    %25 = arith.andi %23, %24 : vector<1x256xi32>
    %c0_16 = arith.constant 0 : index
    %c0_17 = arith.constant 0 : index
    %c0_18 = arith.constant 0 : index
    %26 = vector.load %arg7[%c0_16, %c0_17, %c0_18] : memref<1x1x256xbf16, #tpu.memory_space<vmem>>, vector<1x1x256xbf16>
    %27 = vector.shape_cast %26 : vector<1x1x256xbf16> to vector<1x256xbf16>
    %28 = arith.extf %27 : vector<1x256xbf16> to vector<1x256xf32>
    %29 = tpu.iota {dimensions = array<i32: 0>} : vector<8x256xi32>
    %30 = vector.broadcast %25 : vector<1x256xi32> to vector<8x256xi32>
    %31 = arith.cmpi eq, %29, %30 : vector<8x256xi32>
    %32 = arith.extui %31 : vector<8x256xi1> to vector<8x256xi32>
    %33 = arith.sitofp %32 : vector<8x256xi32> to vector<8x256xf32>
    %c255_i32_19 = arith.constant 255 : i32
    %34 = vector.broadcast %c255_i32_19 : i32 to vector<1x256xi32>
    %35 = arith.cmpi ne, %25, %34 : vector<1x256xi32>
    %36 = arith.extui %35 : vector<1x256xi1> to vector<1x256xi32>
    %37 = arith.sitofp %36 : vector<1x256xi32> to vector<1x256xf32>
    %cst_20 = arith.constant dense<0xFF800000> : vector<256xf32>
    %38 = vector.multi_reduction <maximumf>, %10, %cst_20 [0] : vector<8x256xf32> to vector<256xf32>
    %39 = vector.shape_cast %38 : vector<256xf32> to vector<1x256xf32>
    %40 = vector.broadcast %39 : vector<1x256xf32> to vector<8x256xf32>
    %41 = arith.subf %10, %40 : vector<8x256xf32>
    %42 = math.exp %41 : vector<8x256xf32>
    %cst_21 = arith.constant dense<0.000000e+00> : vector<256xf32>
    %43 = vector.multi_reduction <add>, %42, %cst_21 [0] : vector<8x256xf32> to vector<256xf32>
    %44 = vector.shape_cast %43 : vector<256xf32> to vector<1x256xf32>
    %45 = math.log %44 : vector<1x256xf32>
    %46 = arith.addf %39, %45 : vector<1x256xf32>
    %47 = arith.mulf %10, %33 : vector<8x256xf32>
    %cst_22 = arith.constant dense<0.000000e+00> : vector<256xf32>
    %48 = vector.multi_reduction <add>, %47, %cst_22 [0] : vector<8x256xf32> to vector<256xf32>
    %49 = vector.shape_cast %48 : vector<256xf32> to vector<1x256xf32>
    %50 = arith.subf %46, %49 : vector<1x256xf32>
    %cst_23 = arith.constant dense<0xFF800000> : vector<256xf32>
    %51 = vector.multi_reduction <maximumf>, %11, %cst_23 [0] : vector<8x256xf32> to vector<256xf32>
    %52 = vector.shape_cast %51 : vector<256xf32> to vector<1x256xf32>
    %53 = vector.broadcast %52 : vector<1x256xf32> to vector<8x256xf32>
    %54 = arith.subf %11, %53 : vector<8x256xf32>
    %55 = math.exp %54 : vector<8x256xf32>
    %cst_24 = arith.constant dense<0.000000e+00> : vector<256xf32>
    %56 = vector.multi_reduction <add>, %55, %cst_24 [0] : vector<8x256xf32> to vector<256xf32>
    %57 = vector.shape_cast %56 : vector<256xf32> to vector<1x256xf32>
    %58 = math.log %57 : vector<1x256xf32>
    %59 = arith.addf %52, %58 : vector<1x256xf32>
    %60 = arith.mulf %11, %33 : vector<8x256xf32>
    %cst_25 = arith.constant dense<0.000000e+00> : vector<256xf32>
    %61 = vector.multi_reduction <add>, %60, %cst_25 [0] : vector<8x256xf32> to vector<256xf32>
    %62 = vector.shape_cast %61 : vector<256xf32> to vector<1x256xf32>
    %63 = arith.subf %59, %62 : vector<1x256xf32>
    %64 = vector.broadcast %52 : vector<1x256xf32> to vector<8x256xf32>
    %65 = arith.cmpf oge, %11, %64 : vector<8x256xf32>
    %c8_i32 = arith.constant 8 : i32
    %66 = vector.broadcast %c8_i32 : i32 to vector<8x256xi32>
    %67 = arith.select %65, %29, %66 : vector<8x256xi1>, vector<8x256xi32>
    %cst_26 = arith.constant dense<2147483647> : vector<256xi32>
    %68 = vector.multi_reduction <minsi>, %67, %cst_26 [0] : vector<8x256xi32> to vector<256xi32>
    %69 = vector.shape_cast %68 : vector<256xi32> to vector<1x256xi32>
    %c0_i32_27 = arith.constant 0 : i32
    %70 = vector.broadcast %c0_i32_27 : i32 to vector<1x256xi32>
    %71 = arith.cmpi sge, %25, %70 : vector<1x256xi32>
    %72 = arith.extui %71 : vector<1x256xi1> to vector<1x256xi32>
    %73 = arith.sitofp %72 : vector<1x256xi32> to vector<1x256xf32>
    %74 = arith.cmpi eq, %69, %25 : vector<1x256xi32>
    %75 = arith.extui %74 : vector<1x256xi1> to vector<1x256xi32>
    %76 = arith.sitofp %75 : vector<1x256xi32> to vector<1x256xf32>
    %77 = arith.mulf %76, %73 : vector<1x256xf32>
    %cst_28 = arith.constant 0.000000e+00 : f32
    %78 = vector.broadcast %cst_28 : f32 to vector<1x256xf32>
    %79 = arith.maximumf %12, %78 : vector<1x256xf32>
    %80 = arith.mulf %12, %28 : vector<1x256xf32>
    %81 = arith.subf %79, %80 : vector<1x256xf32>
    %82 = math.absf %12 : vector<1x256xf32>
    %cst_29 = arith.constant 0.000000e+00 : f32
    %83 = vector.broadcast %cst_29 : f32 to vector<1x256xf32>
    %84 = arith.subf %83, %82 : vector<1x256xf32>
    %85 = math.exp %84 : vector<1x256xf32>
    %cst_30 = arith.constant 1.000000e+00 : f32
    %86 = vector.broadcast %cst_30 : f32 to vector<1x256xf32>
    %87 = arith.addf %86, %85 : vector<1x256xf32>
    %88 = math.log %87 : vector<1x256xf32>
    %89 = arith.addf %81, %88 : vector<1x256xf32>
    %cst_31 = arith.constant 1.000000e+00 : f32
    %90 = vector.broadcast %cst_31 : f32 to vector<1x256xf32>
    %91 = arith.cmpf oeq, %28, %90 : vector<1x256xf32>
    %92 = arith.extui %91 : vector<1x256xi1> to vector<1x256xi32>
    %93 = arith.sitofp %92 : vector<1x256xi32> to vector<1x256xf32>
    %cst_32 = arith.constant 0.000000e+00 : f32
    %94 = vector.broadcast %cst_32 : f32 to vector<1x256xf32>
    %95 = arith.cmpf oeq, %28, %94 : vector<1x256xf32>
    %96 = arith.extui %95 : vector<1x256xi1> to vector<1x256xi32>
    %97 = arith.sitofp %96 : vector<1x256xi32> to vector<1x256xf32>
    %cst_33 = arith.constant 1.38629436 : f32
    %98 = vector.broadcast %cst_33 : f32 to vector<1x256xf32>
    %99 = arith.cmpf ogt, %12, %98 : vector<1x256xf32>
    %cst_34 = arith.constant 0.000000e+00 : f32
    %100 = vector.broadcast %cst_34 : f32 to vector<1x256xf32>
    %101 = arith.select %99, %37, %100 : vector<1x256xi1>, vector<1x256xf32>
    %102 = arith.mulf %50, %37 : vector<1x256xf32>
    %103 = arith.mulf %63, %37 : vector<1x256xf32>
    %104 = arith.mulf %89, %93 : vector<1x256xf32>
    %105 = arith.mulf %89, %97 : vector<1x256xf32>
    %106 = arith.mulf %63, %101 : vector<1x256xf32>
    %c0_35 = arith.constant 0 : index
    %c0_36 = arith.constant 0 : index
    %107 = vector.load %arg11[%c0_35, %c0_36] : memref<16x256xf32, #tpu.memory_space<vmem>>, vector<1x256xf32>
    %108 = arith.addf %107, %102 : vector<1x256xf32>
    %c0_37 = arith.constant 0 : index
    %c0_38 = arith.constant 0 : index
    %109 = vector.load %arg11[%c0_37, %c0_38] : memref<16x256xf32, #tpu.memory_space<vmem>>, vector<1x256xf32>
    tpu.vector_store %arg11[%c0_37, %c0_38], %108 {strides = array<i32>} : memref<16x256xf32, #tpu.memory_space<vmem>>, vector<1x256xf32>,
    %c1 = arith.constant 1 : index
    %c0_39 = arith.constant 0 : index
    %110 = vector.load %arg11[%c1, %c0_39] : memref<16x256xf32, #tpu.memory_space<vmem>>, vector<1x256xf32>
    %111 = arith.addf %110, %103 : vector<1x256xf32>
    %c1_40 = arith.constant 1 : index
    %c0_41 = arith.constant 0 : index
    %112 = vector.load %arg11[%c1_40, %c0_41] : memref<16x256xf32, #tpu.memory_space<vmem>>, vector<1x256xf32>
    tpu.vector_store %arg11[%c1_40, %c0_41], %111 {strides = array<i32>} : memref<16x256xf32, #tpu.memory_space<vmem>>, vector<1x256xf32>,
    %c2 = arith.constant 2 : index
    %c0_42 = arith.constant 0 : index
    %113 = vector.load %arg11[%c2, %c0_42] : memref<16x256xf32, #tpu.memory_space<vmem>>, vector<1x256xf32>
    %114 = arith.addf %113, %37 : vector<1x256xf32>
    %c2_43 = arith.constant 2 : index
    %c0_44 = arith.constant 0 : index
    %115 = vector.load %arg11[%c2_43, %c0_44] : memref<16x256xf32, #tpu.memory_space<vmem>>, vector<1x256xf32>
    tpu.vector_store %arg11[%c2_43, %c0_44], %114 {strides = array<i32>} : memref<16x256xf32, #tpu.memory_space<vmem>>, vector<1x256xf32>,
    %c3 = arith.constant 3 : index
    %c0_45 = arith.constant 0 : index
    %116 = vector.load %arg11[%c3, %c0_45] : memref<16x256xf32, #tpu.memory_space<vmem>>, vector<1x256xf32>
    %117 = arith.addf %116, %77 : vector<1x256xf32>
    %c3_46 = arith.constant 3 : index
    %c0_47 = arith.constant 0 : index
    %118 = vector.load %arg11[%c3_46, %c0_47] : memref<16x256xf32, #tpu.memory_space<vmem>>, vector<1x256xf32>
    tpu.vector_store %arg11[%c3_46, %c0_47], %117 {strides = array<i32>} : memref<16x256xf32, #tpu.memory_space<vmem>>, vector<1x256xf32>,
    %c4 = arith.constant 4 : index
    %c0_48 = arith.constant 0 : index
    %119 = vector.load %arg11[%c4, %c0_48] : memref<16x256xf32, #tpu.memory_space<vmem>>, vector<1x256xf32>
    %120 = arith.addf %119, %73 : vector<1x256xf32>
    %c4_49 = arith.constant 4 : index
    %c0_50 = arith.constant 0 : index
    %121 = vector.load %arg11[%c4_49, %c0_50] : memref<16x256xf32, #tpu.memory_space<vmem>>, vector<1x256xf32>
    tpu.vector_store %arg11[%c4_49, %c0_50], %120 {strides = array<i32>} : memref<16x256xf32, #tpu.memory_space<vmem>>, vector<1x256xf32>,
    %c5 = arith.constant 5 : index
    %c0_51 = arith.constant 0 : index
    %122 = vector.load %arg11[%c5, %c0_51] : memref<16x256xf32, #tpu.memory_space<vmem>>, vector<1x256xf32>
    %123 = arith.addf %122, %104 : vector<1x256xf32>
    %c5_52 = arith.constant 5 : index
    %c0_53 = arith.constant 0 : index
    %124 = vector.load %arg11[%c5_52, %c0_53] : memref<16x256xf32, #tpu.memory_space<vmem>>, vector<1x256xf32>
    tpu.vector_store %arg11[%c5_52, %c0_53], %123 {strides = array<i32>} : memref<16x256xf32, #tpu.memory_space<vmem>>, vector<1x256xf32>,
    %c6 = arith.constant 6 : index
    %c0_54 = arith.constant 0 : index
    %125 = vector.load %arg11[%c6, %c0_54] : memref<16x256xf32, #tpu.memory_space<vmem>>, vector<1x256xf32>
    %126 = arith.addf %125, %105 : vector<1x256xf32>
    %c6_55 = arith.constant 6 : index
    %c0_56 = arith.constant 0 : index
    %127 = vector.load %arg11[%c6_55, %c0_56] : memref<16x256xf32, #tpu.memory_space<vmem>>, vector<1x256xf32>
    tpu.vector_store %arg11[%c6_55, %c0_56], %126 {strides = array<i32>} : memref<16x256xf32, #tpu.memory_space<vmem>>, vector<1x256xf32>,
    %c7 = arith.constant 7 : index
    %c0_57 = arith.constant 0 : index
    %128 = vector.load %arg11[%c7, %c0_57] : memref<16x256xf32, #tpu.memory_space<vmem>>, vector<1x256xf32>
    %129 = arith.addf %128, %93 : vector<1x256xf32>
    %c7_58 = arith.constant 7 : index
    %c0_59 = arith.constant 0 : index
    %130 = vector.load %arg11[%c7_58, %c0_59] : memref<16x256xf32, #tpu.memory_space<vmem>>, vector<1x256xf32>
    tpu.vector_store %arg11[%c7_58, %c0_59], %129 {strides = array<i32>} : memref<16x256xf32, #tpu.memory_space<vmem>>, vector<1x256xf32>,
    %c8 = arith.constant 8 : index
    %c0_60 = arith.constant 0 : index
    %131 = vector.load %arg11[%c8, %c0_60] : memref<16x256xf32, #tpu.memory_space<vmem>>, vector<1x256xf32>
    %132 = arith.addf %131, %97 : vector<1x256xf32>
    %c8_61 = arith.constant 8 : index
    %c0_62 = arith.constant 0 : index
    %133 = vector.load %arg11[%c8_61, %c0_62] : memref<16x256xf32, #tpu.memory_space<vmem>>, vector<1x256xf32>
    tpu.vector_store %arg11[%c8_61, %c0_62], %132 {strides = array<i32>} : memref<16x256xf32, #tpu.memory_space<vmem>>, vector<1x256xf32>,
    %c9 = arith.constant 9 : index
    %c0_63 = arith.constant 0 : index
    %134 = vector.load %arg11[%c9, %c0_63] : memref<16x256xf32, #tpu.memory_space<vmem>>, vector<1x256xf32>
    %135 = arith.addf %134, %106 : vector<1x256xf32>
    %c9_64 = arith.constant 9 : index
    %c0_65 = arith.constant 0 : index
    %136 = vector.load %arg11[%c9_64, %c0_65] : memref<16x256xf32, #tpu.memory_space<vmem>>, vector<1x256xf32>
    tpu.vector_store %arg11[%c9_64, %c0_65], %135 {strides = array<i32>} : memref<16x256xf32, #tpu.memory_space<vmem>>, vector<1x256xf32>,
    %c10 = arith.constant 10 : index
    %c0_66 = arith.constant 0 : index
    %137 = vector.load %arg11[%c10, %c0_66] : memref<16x256xf32, #tpu.memory_space<vmem>>, vector<1x256xf32>
    %138 = arith.addf %137, %101 : vector<1x256xf32>
    %c10_67 = arith.constant 10 : index
    %c0_68 = arith.constant 0 : index
    %139 = vector.load %arg11[%c10_67, %c0_68] : memref<16x256xf32, #tpu.memory_space<vmem>>, vector<1x256xf32>
    tpu.vector_store %arg11[%c10_67, %c0_68], %138 {strides = array<i32>} : memref<16x256xf32, #tpu.memory_space<vmem>>, vector<1x256xf32>,
    %c0_i32_69 = arith.constant 0 : i32
    %140 = arith.cmpi eq, %arg2, %c0_i32_69 : i32
    %141 = arith.extui %140 : i1 to i32
    %c0_i32_70 = arith.constant 0 : i32
    %142 = arith.cmpi ne, %141, %c0_i32_70 : i32
    scf.if %142 {
      %c0_71 = arith.constant 0 : index
      %c0_72 = arith.constant 0 : index
      %143 = vector.load %arg11[%c0_71, %c0_72] : memref<16x256xf32, #tpu.memory_space<vmem>>, vector<16x256xf32>
      %cst_73 = arith.constant dense<0.000000e+00> : vector<16xf32>
      %144 = vector.multi_reduction <add>, %143, %cst_73 [1] : vector<16x256xf32> to vector<16xf32>
      %145 = vector.shape_cast %144 : vector<16xf32> to vector<16x1xf32>
      %146 = vector.shape_cast %145 : vector<16x1xf32> to vector<1x1x16x1xf32>
      %147 = vector.shape_cast %146 : vector<1x1x16x1xf32> to vector<1x1x16x1xf32>
      %148 = vector.broadcast %147 : vector<1x1x16x1xf32> to vector<1x1x16x128xf32>
      %c0_74 = arith.constant 0 : index
      %c0_75 = arith.constant 0 : index
      %c0_76 = arith.constant 0 : index
      %c0_77 = arith.constant 0 : index
      %149 = vector.load %arg10[%c0_74, %c0_75, %c0_76, %c0_77] : memref<1x1x16x128xf32, #tpu.memory_space<vmem>>, vector<1x1x16x128xf32>
      tpu.vector_store %arg10[%c0_74, %c0_75, %c0_76, %c0_77], %148 {strides = array<i32>} : memref<1x1x16x128xf32, #tpu.memory_space<vmem>>, vector<1x1x16x128xf32>,
    } else {
    }
    return
  }
  func.func @transform_0(%arg0: i32, %arg1: i32, %arg2: i32) -> (i32, i32, i32) {
    %c1_i32 = arith.constant 1 : i32
    %0 = arith.muli %arg1, %c1_i32 : i32
    %1 = arith.addi %0, %arg2 : i32
    %c0_i32 = arith.constant 0 : i32
    %c0_i32_0 = arith.constant 0 : i32
    return %arg0, %c0_i32, %1 : i32, i32, i32
  }
  func.func @transform_1(%arg0: i32, %arg1: i32, %arg2: i32) -> (i32, i32) {
    %c0_i32 = arith.constant 0 : i32
    %c0_i32_0 = arith.constant 0 : i32
    %c0_i32_1 = arith.constant 0 : i32
    return %c0_i32, %c0_i32_0 : i32, i32
  }
  func.func @transform_2(%arg0: i32, %arg1: i32, %arg2: i32) -> (i32, i32) {
    %c0_i32 = arith.constant 0 : i32
    %c0_i32_0 = arith.constant 0 : i32
    %c0_i32_1 = arith.constant 0 : i32
    return %c0_i32, %c0_i32_0 : i32, i32
  }
  func.func @transform_3(%arg0: i32, %arg1: i32, %arg2: i32) -> (i32, i32, i32) {
    %c1_i32 = arith.constant 1 : i32
    %0 = arith.muli %arg1, %c1_i32 : i32
    %1 = arith.addi %0, %arg2 : i32
    %c0_i32 = arith.constant 0 : i32
    %c0_i32_0 = arith.constant 0 : i32
    return %arg0, %c0_i32, %1 : i32, i32, i32
  }
  func.func @transform_4(%arg0: i32, %arg1: i32, %arg2: i32) -> (i32, i32, i32) {
    %c1_i32 = arith.constant 1 : i32
    %0 = arith.muli %arg1, %c1_i32 : i32
    %1 = arith.addi %0, %arg2 : i32
    %c0_i32 = arith.constant 0 : i32
    %c0_i32_0 = arith.constant 0 : i32
    return %arg0, %c0_i32, %1 : i32, i32, i32
  }
  func.func @transform_5(%arg0: i32, %arg1: i32, %arg2: i32) -> (i32, i32, i32) {
    %c1_i32 = arith.constant 1 : i32
    %0 = arith.muli %arg1, %c1_i32 : i32
    %1 = arith.addi %0, %arg2 : i32
    %c0_i32 = arith.constant 0 : i32
    %c0_i32_0 = arith.constant 0 : i32
    return %arg0, %c0_i32, %1 : i32, i32, i32
  }
  func.func @transform_6(%arg0: i32, %arg1: i32, %arg2: i32) -> (i32, i32, i32) {
    %c1_i32 = arith.constant 1 : i32
    %0 = arith.muli %arg1, %c1_i32 : i32
    %1 = arith.addi %0, %arg2 : i32
    %c0_i32 = arith.constant 0 : i32
    %c0_i32_0 = arith.constant 0 : i32
    return %arg0, %c0_i32, %1 : i32, i32, i32
  }
  func.func @transform_7(%arg0: i32, %arg1: i32, %arg2: i32) -> (i32, i32, i32, i32) {
    %c0_i32 = arith.constant 0 : i32
    %c0_i32_0 = arith.constant 0 : i32
    %c0_i32_1 = arith.constant 0 : i32
    return %arg0, %arg1, %c0_i32, %c0_i32_0 : i32, i32, i32, i32
  }
}

</mosaic_0001>

<bundles_post_ra>
// kernel: tpu_custom_call.1
= control target key start
LH: loop header
LB: loop body
LE: loop exit
PB: predicated region body
PF: predicated region fallthrough
CT: control target
= control target key end

     0   :  { %s2062_s0 = inlined_call_operand.vmem [shape: bf16[2,4,256], index: 0, kind: input, shape index: {}]   ;;  %s2063_s1 = inlined_call_operand.vmem [shape: bf16[17,4], index: 1, kind: input, shape index: {}]   ;;  %s2064_s2 = inlined_call_operand.vmem [shape: f32[17,1], index: 2, kind: input, shape index: {}]   ;;  %s2065_s3 = inlined_call_operand.vmem [shape: s8[2,1,256], index: 3, kind: input, shape index: {}]   ;;  %s2066_s4 = inlined_call_operand.vmem [shape: bf16[2,1,256], index: 4, kind: input, shape index: {}]   ;;  %s2067_s5 = inlined_call_operand.hbm [shape: bf16[2,8,256], index: 5, kind: output, shape index: {0}]   ;;  %s2068_s6 = inlined_call_operand.hbm [shape: bf16[2,8,256], index: 6, kind: output, shape index: {1}]   ;;  %s2069_s7 = inlined_call_operand.hbm [shape: f32[2,1,16,128], index: 7, kind: output, shape index: {2}]  }
   0x1   :  { %2073 = sst [smem:[#allocation10_spill]] %s2062_s0 }
   0x2   :  { %2074 = sst [smem:[#allocation11_spill]] %s2063_s1 }
   0x3   :  { %2075 = sst [smem:[#allocation12_spill]] %s2064_s2 }
   0x4   :  { %13 = vsyncpa [#allocation4], 0 }
   0x5   :  { %15 = vsyncpa [#allocation4 + $0x1], 0 }
   0x6   :  { %16 = vsyncpa [#allocation6], 0 }
   0x7   :  { %18 = vsyncpa [#allocation6 + $0x1], 0  ;;  %s1647_s24 = smov 0   ;;  %s1649_s25 = smov 0  }
   0x8   :  { %s1651_s26 = smov 0   ;;  %s1653_s27 = smov 0  }
   0x9   :  { %s1655_s28 = smov 0   ;;  %s1657_s29 = smov 0  }
   0xa LB: > { %s2071_s30 = sadd.s32 4294967295, %s1597_s29   ;;  %s2070_s8 = sadd.s32 4294967294, %s1597_s29   ;;  %s1597_s29 = sphi %s1657_s29, %s24_s29   ;;  %s1593_s28 = sphi %s1655_s28, %s2090_s28   ;;  %s1589_s27 = sphi %s1653_s27, %s2089_s27   ;;  %s1585_s26 = sphi %s1651_s26, %s2088_s26   ;;  %s1581_s25 = sphi %s1649_s25, %s2087_s25   ;;  %s1577_s24 = sphi %s1647_s24, %s2086_s24  }
   0xb   : > { %s43_s9 = sadd.s32 1, %s1593_s28  ;;  %s186_s10 = sadd.s32 1, %s1585_s26 }
   0xc   : > { %p45_p0 = scmp.ge.s32.totalorder %s43_s9, 2  ;;  %p196_p1 = scmp.ne.s32.totalorder %s1585_s26, %s1581_s25 }
   0xd   : > { %p197_p2 = scmp.eq.s32.totalorder %s2071_s30, 1  ;;  %p202_p3 = scmp.ne.s32.totalorder %s1581_s25, %s1577_s24 }
   0xe   : > { %s2092_s9 = smov (%p45_p0, %s43_s9), 0  ;;  %p203_p5 = scmp.eq.s32.totalorder %s2070_s8, 1 }
   0xf   : > { %p1689_p4 = por %p197_p2, %p196_p1  ;;  %s181_s12 = ssub.s32 %s1593_s28, %s2092_s9 }
  0x10   : > { %p1318_p6 = scmp.ge.s32.totalorder %s1597_s29, 1  ;;  %p184_p7 = scmp.eq.s32.totalorder %s181_s12, 0 }
  0x11   : > { %p1698_p8 = por %p203_p5, %p202_p3  ;;  %p328_p9 = scmp.lt.s32.totalorder %s1597_s29, 3 }
  0x12   : > { %s1704_s14 = scalar_select %p184_p7, %s1585_s26, %s186_s10  }
  0x13   : > { %p329_p10 = pnand %p1318_p6, %p328_p9 }
  0x14   : > { %p395_p11 = scmp.lt.s32.totalorder (!%p329_p10), %s1589_s27, 1  ;;  %v1599_v0 = vmov (!%p329_p10), 0.0   ;;  %v1600_v1 = vmov (!%p329_p10), 0   ;;  %s2078_s2 = sld [smem:[#allocation12_spill]] (!%p329_p10)  ;;  %v1601_v3 = vmov (!%p329_p10), 1966171168   ;;  %v567_v6 = vlaneseq (!%p329_p10) }
  0x15   : > { %332 = sbr.rel (%p329_p10) target bundleno = 499 (0x1f3), region = 40  ;;  %436 = vst [vmem:[#allocation2] sm:$0xff] (!%p329_p10), %v1599_v0  ;;  %437 = vst [vmem:[#allocation2 + $0x8] sm:$0xff] (!%p329_p10), %v1599_v0  ;;  %525 = vmatprep.mubr.bf16.mxu0 (!%p329_p10), %v1600_v1  ;;  %535 = vmatprep.mubr.bf16.mxu1 (!%p329_p10), %v1600_v1  ;;  %v833_v4 = vunpack.c.l.s4 (!%p329_p10), %v1601_v3  ;;  %vm486_vm0 = vcmask (!%p329_p10), 1041408   ;;  %s2079_s0 = sld [smem:[#allocation10_spill]] (!%p329_p10)  ;;  %vm479_vm3 = vcmask (!%p329_p10), 31744  }
  0x16   : > { %438 = vst [vmem:[#allocation2 + $0x10] sm:$0xff] (!%p329_p10), %v1599_v0  ;;  %439 = vst [vmem:[#allocation2 + $0x18] sm:$0xff] (!%p329_p10), %v1599_v0  ;;  %1431 = vset.pattern.permute.xlu0 (!%p329_p10), %v1600_v1  ;;  %1432 = vset.pattern.permute.xlu1 (!%p329_p10), %v1600_v1  ;;  %v1734_v17 = vshrl.u32 (!%p329_p10), %v567_v6, 7  ;;  %s2080_s1 = sld [smem:[#allocation11_spill]] (!%p329_p10)  ;;  %vm1764_vm5 = vcmp.lt.s32.totalorder (!%p329_p10), %v567_v6, 256  ;;  %s1829_s22 = sand.u32 (!%p329_p10), 1, %s1581_s25  }
  0x17   : > { %v834_v13 = vunpack.c.0.s8 (!%p329_p10), %v833_v4  ;;  %s1319_s23 = sshll.u32 (!%p329_p10), %s1829_s22, 3  ;;  %s2083_s16 = sadd.s32 (!%p329_p10), 4294967295, %s1597_s29  }
  0x18   : > { %v1780_v40 = vsub.s32 (!%p329_p10), 0, %v1734_v17  ;;  %v1783_v41 = vsub.s32 (!%p329_p10), 4, %v1734_v17  ;;  %s1869_s12 = scalar_lea.vmem (!%p329_p10), [#allocation5], %s1319_s23  ;;  %s2072_s18 = sshll.u32 (!%p329_p10), %s1589_s27, 7 }
  0x19   : > { %v1746_v20 = vsub.s32 (!%p329_p10), %v834_v13, %v1734_v17  ;;  %s1957_s30 = scalar_lea.hbm (!%p329_p10), %s2068_s6, %s2072_s18  ;;  %s1118_s8 = sshll.u32 (!%p329_p10), %s1869_s12, 4  ;;  %s1119_s8 = int_to_ptr.vmem [resolvable:$true] %s1118_s8 }
  0x1a   : > { %v444_v2 = vld [vmem:[%s2078_s2] sm:$0xff] (!%p329_p10)  ;;  %v446_v5 = vld [vmem:[%s2078_s2 + $0x10] sm:$0x1] (!%p329_p10)  ;;  %v445_v7 = vld [vmem:[%s2078_s2 + $0x8] sm:$0xff] (!%p329_p10) }
  0x1b   : > { %449 = vperm.xlu0 (!%p329_p10), %1431, %v444_v2   ;;  %459 = vperm.xlu1 (!%p329_p10), %1432, %v446_v5  }
  0x1c   : > { %s396_s15 = scalar_select %p395_p11, %s1589_s27, 1  ;;  %v1433_v18 = vld [vmem:[%s2080_s1] sm:$0xff]   ;;  %v1434_v19 = vld [vmem:[%s2080_s1 + $0x8] ss:$0 sps:$4 sm:$0x11]  }
  0x1d   : > { %v987_v23 = vld [vmem:[#allocation2 + $0x7] ss:$8 sm:$0x3]  ;;  %v1000_v27 = vld [vmem:[#allocation2 + $0x10] ss:$8 sm:$0x3] }
  0x1e   : > { %s1353_s20 = sshll.u32 %s396_s15, 2  ;;  %s1324_s21 = sshll.u32 %s396_s15, 1  ;;  %v921_v28 = vld [vmem:[#allocation2 + $0x4] ss:$8 sm:$0x3] }
  0x1f   : > { %s402_s10 = scalar_lea.vmem %s2079_s0, %s1353_s20  ;;  %s413_s17 = scalar_lea.vmem %s2065_s3, %s1324_s21  ;;  %454 = vperm.xlu0 %1431, %v445_v7   ;;  %v878_v37 = vld [vmem:[#allocation2 + $0x2] ss:$8 sm:$0x3] }
  0x20   : > { %s424_s15 = scalar_lea.vmem %s2066_s4, %s1324_s21  ;;  %v1328_v8 = vld.sshfl [vmem:[%s402_s10] sm:$0x33 pattern:$0x76325410]  ;;  %s1855_s10 = scalar_lea.vmem [#allocation3], %s1319_s23 }
  0x21   : > { %v562_v9 = vld [vmem:[%s413_s17] sm:$0x3]  ;;  %v478_v10 = vcombine.high %v1328_v8, %v1328_v8  ;;  %v488_v14 = vsel %vm486_vm0, %v1328_v8, 0  ;;  %s1949_s17 = sand.u32 1, %s2083_s16   ;;  %s1459_s21 = scalar_lea.vmem %s1119_s8, 128 }
  0x22   : > { %v563_v11 = vunpack.c.0.s8 %v562_v9  ;;  %v565_v12 = vld [vmem:[%s424_s15] sm:$0x3]  ;;  %s1079_s20 = scalar_lea.sflag [#allocation6], %s1949_s17  ;;  %p1460_p12 = scmp.ne.s32.totalorder %s1119_s8, %s1459_s21 }
  0x23   : > { %v1731_v15 = vunpack.c.l.bf16 %v565_v12  ;;  %1329 = vmatprep.subr.msk.bf16.mxu0 %vm486_vm0, %v478_v10  ;;  %1359 = vmatprep.subr.msk.bf16.mxu1 %vm486_vm0, %v478_v10  ;;  %s1602_s23 = smov [#allocation5]  }
  0x24   : > { %v564_v16 = vand.u32 255, %v563_v11  ;;  %494 = vmatpush1.bf16.msra.mxu0 %v488_v14  ;;  %1360 = vmatpush1.bf16.msra.mxu1 %v488_v14  ;;  %p1461_p13 = pnand %p1460_p12, %p1689_p4  ;;  %s1463_s0 = sshll.u32 %s1602_s23, 4  ;;  %s1464_s0 = int_to_ptr.vmem [resolvable:$false] %s1463_s0 }
  0x25   : > { %vm775_vm1 = vcmp.eq.f32.partialorder %v1731_v15, 1.0  ;;  %vm778_vm2 = vcmp.eq.f32.partialorder %v1731_v15, 0.0  ;;  %s1465_s16 = scalar_lea.vmem %s1464_s0, 256  ;;  %p1466_p1 = scmp.lt.s32.totalorder %s1119_s8, %s1464_s0 }
  0x26   : > { %vm720_vm4 = vcmp.ge.s32.totalorder %v564_v16, 0  ;;  %v1752_v22 = vsel %vm775_vm1, 1.0, %v1599_v0  ;;  %v1755_v24 = vsel %vm778_vm2, 1.0, %v1599_v0  ;;  %vm591_vm6 = vcmp.ne.s32.totalorder %v564_v16, 255  ;;  %p1462_p0 = pneg %p1461_p13  ;;  %p1467_p2 = scmp.lt.s32.totalorder %s1465_s16, %s1459_s21 }
  0x27   : > { %v1749_v21 = vsel %vm720_vm4, 1.0, %v1599_v0  ;;  %v994_v26 = vrot.slane %v1752_v22, %v1746_v20  ;;  %1330 = vmatmul.mubr.msk.bf16.vlgmr.msra.gmra.mrb[0].mxu0 %vm479_vm3, %v1433_v18  ;;  %v1007_v29 = vrot.slane %v1755_v24, %v1746_v20  ;;  %1331 = vmatmul.mubr.msk.bf16.vlgmr.msra.gmra.mrb[0].mxu1 %vm479_vm3, %v1434_v19  ;;  %v1336_v35 = vsel %vm591_vm6, 1.0, %v1599_v0 }
  0x28   : > { %v928_v25 = vrot.slane %v1749_v21, %v1746_v20  ;;  %v885_v36 = vrot.slane %v1336_v35, %v1746_v20  ;;  %v1786_v42 = vrot.slane %v564_v16, %v1780_v40  ;;  %v1789_v43 = vrot.slane %v564_v16, %v1783_v41  ;;  %p1468_p3 = por %p1467_p2, %p1466_p1 }
  0x29   : > { %v996_v31 = vadd.f32 %v994_v26, %v987_v23  ;;  %v1009_v33 = vadd.f32 %v1007_v29, %v1000_v27  ;;  %v1801_v53 = vrot.slane %v1336_v35, %v1780_v40  ;;  %v1823_v12 = vrot.slane %v1336_v35, %v1783_v41 }
  0x2a   : > { %v935_v30 = vrot.slane %v928_v25, %v1746_v20  ;;  %v892_v38 = vrot.slane %v885_v36, %v1746_v20  ;;  %v580_v44 = vrot.slane %v1786_v42, %v1780_v40  ;;  %v584_v46 = vrot.slane %v1789_v43, %v1780_v40  ;;  %p1469_p5 = pnand %p1468_p3, %p1462_p0 }
  0x2b   : > { %997 = vst.msk [vmem:[#allocation2 + $0x7] ss:$8 sm:$0x3] %vm1764_vm5, %v996_v31  ;;  %1010 = vst.msk [vmem:[#allocation2 + $0x10] ss:$8 sm:$0x3] %vm1764_vm5, %v1009_v33 }
  0x2c   : > { %v937_v34 = vadd.f32 %v935_v30, %v921_v28  ;;  %v894_v39 = vadd.f32 %v892_v38, %v878_v37  ;;  %vm585_vm7 = vcmp.eq.s32.totalorder %v1734_v17, %v580_v44  ;;  %vm586_vm8 = vcmp.eq.s32.totalorder %v1734_v17, %v584_v46 }
  0x2d   : > { %v1334_v50 = vsel %vm585_vm7, 1.0, %v1599_v0  ;;  %v1335_v61 = vsel %vm586_vm8, 1.0, %v1599_v0 }
  0x2e   : > { %938 = vst.msk [vmem:[#allocation2 + $0x4] ss:$8 sm:$0x3] %vm1764_vm5, %v937_v34  ;;  %895 = vst.msk [vmem:[#allocation2 + $0x2] ss:$8 sm:$0x3] %vm1764_vm5, %v894_v39 }
  0x2f   : > { %v1036_v39 = vld [vmem:[#allocation2 + $0x12] ss:$8 sm:$0x3] }
  0x9a   : > { %v450_v45 = vpop.permute.xlu0 %449  ;;  %v460_v47 = vpop.permute.xlu1 %459 }
  0x9e   : > { %v455_v48 = vpop.permute.xlu0 %454 }
  0xfa   : > { %v527_v49 = vpop.f32.mrb[0].mxu0  ;;  %v537_v52 = vpop.f32.mrb[0].mxu1 }
  0xfb   : > { %v1798_v51 = vadd.f32 %v527_v49, %v450_v45  ;;  %v529_v54 = vpop.f32.mrb[1].mxu0  ;;  %v1803_v55 = vadd.f32 %v537_v52, %v460_v47  ;;  %v539_v57 = vpop.f32.mrb[1].mxu1 }
  0xfc   : > { %v530_v56 = vadd.f32 %v529_v54, %v450_v45  ;;  %v531_v58 = vpop.f32.mrb[2].mxu0  ;;  %v541_v63 = vpop.f32.mrb[2].mxu1  ;;  %v1812_v2 = vadd.f32 %v539_v57, %v460_v47 }
  0xfd   : > { %v594_v59 = vrot.slane %v1798_v51, 4  ;;  %v1807_v60 = vmul.f32 %v1334_v50, %v1798_v51  ;;  %v533_v62 = vpop.f32.mrb[3].mxu0  ;;  %v759_v1 = vand.u32 2147483647, %v1803_v55  ;;  %vm781_vm9 = vcmp.gt.f32.partialorder %v1803_v55, 1.3862944 }
  0xfe   : > { %v1814_v3 = vadd.f32 %v531_v58, %v455_v48  ;;  %v542_v4 = vpop.f32.mrb[3].mxu1  ;;  %v1818_v6 = vsel %vm781_vm9, %v1801_v53, 0.0  ;;  %v600_v7 = vrot.slane %v530_v56, 4  ;;  %v1820_v9 = vmul.f32 %v1335_v61, %v530_v56 }
  0xff   : > { %v595_v5 = vmax.f32 %v1798_v51, %v594_v59  ;;  %v761_v8 = vsub.f32 0.0, %v759_v1  ;;  %v760_v14 = vand.u32 2147483647, %v1812_v2  ;;  %vm782_vm10 = vcmp.gt.f32.partialorder %v1812_v2, 1.3862944 }
 0x100   : > { %v601_v11 = vmax.f32 %v530_v56, %v600_v7  ;;  %v646_v16 = vrot.slane %v1814_v3, 4  ;;  %v1832_v27 = vsel %vm782_vm10, %v1823_v12, 0.0  ;;  %v1840_v34 = vmul.f32 %v1334_v50, %v1814_v3 }
 0x101   : > { %v596_v10 = vrot.slane %v595_v5, 2  ;;  %v763_v13 = vmul.f32 1.442695, %v761_v8  ;;  %v762_v23 = vsub.f32 0.0, %v760_v14  ;;  %v1039_v29 = vcombine.low %v1818_v6, %v1832_v27 }
 0x102   : > { %v602_v19 = vrot.slane %v601_v11, 2  ;;  %v647_v30 = vmax.f32 %v1814_v3, %v646_v16  ;;  %v534_v46 = vadd.f32 %v533_v62, %v455_v48  ;;  %v1354_v50 = vpack.c.bf16 %v530_v56, %v1798_v51 }
 0x103   : > { %v597_v18 = vmax.f32 %v595_v5, %v596_v10  ;;  %1435 = vpow2.f32 %v763_v13  ;;  %v765_v28 = vmul.f32 1.442695, %v762_v23  ;;  %v1046_v35 = vrot.slane %v1039_v29, %v1746_v20 }
 0x104   : > { %v603_v26 = vmax.f32 %v601_v11, %v602_v19  ;;  %v648_v36 = vrot.slane %v647_v30, 2  ;;  %v652_v57 = vrot.slane %v534_v46, 4  ;;  %v1851_v59 = vmul.f32 %v1335_v61, %v534_v46  ;;  %552 = vst [vmem:[%s1855_s10] sm:$0xff] %v1354_v50 }
 0x105   : > { %v598_v25 = vrot.slane %v597_v18, 1  ;;  %1437 = vpow2.f32 %v765_v28  ;;  %v1053_v44 = vrot.slane %v1046_v35, %v1746_v20  ;;  %v748_v4 = vrot.slane %v1731_v15, %v1780_v40 }
 0x106   : > { %v604_v33 = vrot.slane %v603_v26, 1  ;;  %v649_v45 = vmax.f32 %v647_v30, %v648_v36  ;;  %v1876_v13 = vsub.s32 2, %v1734_v17  ;;  %v742_v16 = vmax.f32 %v1803_v55, 0.0 }
 0x107   : > { %v1837_v31 = vmax.f32 %v597_v18, %v598_v25  ;;  %v1055_v52 = vadd.f32 %v1053_v44, %v1036_v39  ;;  %v755_v18 = vmul.f32 %v748_v4, %v1803_v55  ;;  %v733_v23 = vrot.slane %v1749_v21, %v1780_v40 }
 0x108   : > { %v1846_v38 = vmax.f32 %v603_v26, %v604_v33  ;;  %v650_v54 = vrot.slane %v649_v45, 1  ;;  %v632_v29 = vrot.slane %v1807_v60, 4  ;;  %v804_v30 = vrot.slane %v1752_v22, %v1780_v40 }
 0x109   : > { %v606_v37 = vsub.f32 %v1798_v51, %v1837_v31  ;;  %1056 = vst.msk [vmem:[#allocation2 + $0x12] ss:$8 sm:$0x3] %vm1764_vm5, %v1055_v52  ;;  %v653_v51 = vmax.f32 %v534_v46, %v652_v57  ;;  %v817_v33 = vrot.slane %v1755_v24, %v1780_v40  ;;  %v752_v55 = vrot.slane %v1731_v15, %v1876_v13 }
 0x10a   : > { %v607_v49 = vsub.f32 %v530_v56, %v1846_v38  ;;  %v1860_v48 = vmax.f32 %v649_v45, %v650_v54  ;;  %v1355_v56 = vpack.c.bf16 %v534_v46, %v1814_v3  ;;  %v757_v39 = vsub.f32 %v742_v16, %v755_v18 }
 0x10b   : > { %v608_v47 = vmul.f32 1.442695, %v606_v37  ;;  %v654_v1 = vrot.slane %v653_v51, 2  ;;  %v808_v44 = vrot.slane %v1752_v22, %v1876_v13  ;;  %v633_v15 = vadd.f32 %v632_v29, %v1807_v60 }
 0x10c   : > { %v610_v58 = vmul.f32 1.442695, %v607_v49  ;;  %v658_v61 = vsub.f32 %v1814_v3, %v1860_v48  ;;  %vm698_vm11 = vcmp.ge.f32.partialorder %v1814_v3, %v1860_v48  ;;  %561 = vst [vmem:[%s1869_s12] sm:$0xff] %v1355_v56  ;;  %v743_v57 = vmax.f32 %v1812_v2, 0.0 }
 0x10d   : > { %1439 = vpow2.f32 %v608_v47  ;;  %v1436_v63 = vpop.eup %1435  ;;  %v700_v5 = vsel %vm698_vm11, %v1734_v17, 8  ;;  %v655_v11 = vmax.f32 %v653_v51, %v654_v1  ;;  %v638_v22 = vrot.slane %v1820_v9, 4 }
 0x10e   : > { %v767_v62 = vadd.f32 1.0, %v1436_v63  ;;  %1441 = vpow2.f32 %v610_v58  ;;  %v660_v8 = vmul.f32 1.442695, %v658_v61  ;;  %v702_v10 = vrot.slane %v700_v5, 4 }
 0x10f   : > { %v1438_v7 = vpop.eup %1437  ;;  %v656_v14 = vrot.slane %v655_v11, 1  ;;  %v756_v58 = vmul.f32 %v752_v55, %v1812_v2  ;;  %v821_v2 = vrot.slane %v1755_v24, %v1876_v13 }
 0x110   : > { %1443 = vlog2.f32 %v767_v62  ;;  %v768_v3 = vadd.f32 1.0, %v1438_v7  ;;  %vm703_vm12 = vcmp.lt.s32.totalorder %v700_v5, %v702_v10 }
 0x111   : > { %1445 = vpow2.f32 %v660_v8  ;;  %v704_v19 = vsel %vm703_vm12, %v700_v5, %v702_v10  ;;  %v1882_v26 = vmax.f32 %v655_v11, %v656_v14  ;;  %v634_v11 = vrot.slane %v633_v15, 2 }
 0x112   : > { %1447 = vlog2.f32 %v768_v3  ;;  %v705_v25 = vrot.slane %v704_v19, 2  ;;  %v758_v14 = vsub.f32 %v743_v57, %v756_v58 }
 0x113   : > { %v659_v36 = vsub.f32 %v534_v46, %v1882_v26  ;;  %vm699_vm14 = vcmp.ge.f32.partialorder %v534_v46, %v1882_v26 }
 0x114   : > { %vm706_vm13 = vcmp.lt.s32.totalorder %v704_v19, %v705_v25  ;;  %v701_v47 = vsel %vm699_vm14, %v1734_v17, 8 }
 0x115   : > { %v707_v45 = vsel %vm706_vm13, %v704_v19, %v705_v25  ;;  %v662_v52 = vmul.f32 1.442695, %v659_v36  ;;  %v711_v46 = vrot.slane %v701_v47, 4 }
 0x116   : > { %v708_v40 = vrot.slane %v707_v45, 1 }
 0x117   : > { %v1440_v28 = vpop.eup %1439  ;;  %1449 = vpow2.f32 %v662_v52  ;;  %vm712_vm0 = vcmp.lt.s32.totalorder %v701_v47, %v711_v46 }
 0x118   : > { %v612_v35 = vrot.slane %v1440_v28, 4  ;;  %v1442_v37 = vpop.eup %1441  ;;  %vm709_vm15 = vcmp.lt.s32.totalorder %v707_v45, %v708_v40  ;;  %v713_v8 = vsel %vm712_vm0, %v701_v47, %v711_v46 }
 0x119   : > { %v618_v50 = vrot.slane %v1442_v37, 4  ;;  %v710_v62 = vsel %vm709_vm15, %v707_v45, %v708_v40  ;;  %v714_v25 = vrot.slane %v713_v8, 2 }
 0x11a   : > { %v613_v49 = vadd.f32 %v1440_v28, %v612_v35  ;;  %v1444_v54 = vpop.eup %1443  ;;  %vm723_vm1 = vcmp.eq.s32.totalorder %v710_v62, %v1786_v42  ;;  %v639_v42 = vadd.f32 %v638_v22, %v1820_v9 }
 0x11b   : > { %v770_v51 = vmul.f32 0.6931472, %v1444_v54  ;;  %v619_v56 = vadd.f32 %v1442_v37, %v618_v50  ;;  %v1446_v17 = vpop.eup %1445  ;;  %v1338_v7 = vsel %vm723_vm1, 1.0, %v1599_v0  ;;  %vm715_vm2 = vcmp.lt.s32.totalorder %v713_v8, %v714_v25 }
 0x11c   : > { %v614_v63 = vrot.slane %v613_v49, 2  ;;  %v1448_v60 = vpop.eup %1447  ;;  %v664_v5 = vrot.slane %v1446_v17, 4  ;;  %v740_v19 = vmul.f32 %v1338_v7, %v733_v23  ;;  %v684_v37 = vrot.slane %v1840_v34, 4 }
 0x11d   : > { %v773_v1 = vadd.f32 %v770_v51, %v757_v39  ;;  %v620_v4 = vrot.slane %v619_v56, 2  ;;  %v772_v16 = vmul.f32 0.6931472, %v1448_v60  ;;  %v716_v39 = vsel %vm715_vm2, %v713_v8, %v714_v25  ;;  %v898_v25 = vld [vmem:[#allocation2 + $0x3] ss:$8 sm:$0x3] }
 0x11e   : > { %v615_v61 = vadd.f32 %v614_v63, %v613_v49  ;;  %v665_v18 = vadd.f32 %v1446_v17, %v664_v5  ;;  %v717_v50 = vrot.slane %v716_v39, 1  ;;  %v737_v23 = vrot.slane %v1749_v21, %v1783_v41  ;;  %v941_v63 = vld [vmem:[#allocation2 + $0x5] ss:$8 sm:$0x3] }
 0x11f   : > { %v621_v3 = vadd.f32 %v620_v4, %v619_v56  ;;  %v811_v29 = vmul.f32 %v804_v30, %v773_v1  ;;  %v824_v35 = vmul.f32 %v817_v33, %v773_v1  ;;  %v774_v36 = vadd.f32 %v772_v16, %v758_v14  ;;  %v964_v41 = vld [vmem:[#allocation2 + $0x6] ss:$8 sm:$0x3] }
 0x120   : > { %v616_v10 = vrot.slane %v615_v61, 1  ;;  %v666_v24 = vrot.slane %v665_v18, 2  ;;  %v640_v30 = vrot.slane %v639_v42, 2  ;;  %vm718_vm3 = vcmp.lt.s32.totalorder %v716_v39, %v717_v50 }
 0x121   : > { %v622_v55 = vrot.slane %v621_v3, 1  ;;  %v812_v45 = vmul.f32 %v808_v44, %v774_v36  ;;  %v825_v47 = vmul.f32 %v821_v2, %v774_v36  ;;  %v1450_v40 = vpop.eup %1449  ;;  %v635_v54 = vadd.f32 %v634_v11, %v633_v15 }
 0x122   : > { %v617_v28 = vadd.f32 %v616_v10, %v615_v61  ;;  %v667_v49 = vadd.f32 %v666_v24, %v665_v18  ;;  %v685_v57 = vadd.f32 %v684_v37, %v1840_v34  ;;  %v670_v58 = vrot.slane %v1450_v40, 4 }
 0x123   : > { %v623_v13 = vadd.f32 %v622_v55, %v621_v3  ;;  %v944_v9 = vcombine.low %v811_v29, %v812_v45  ;;  %v967_v33 = vcombine.low %v824_v35, %v825_v47  ;;  %v719_v46 = vsel %vm718_vm3, %v716_v39, %v717_v50 }
 0x124   : > { %1451 = vlog2.f32 %v617_v28  ;;  %v668_v52 = vrot.slane %v667_v49, 1  ;;  %vm724_vm4 = vcmp.eq.s32.totalorder %v719_v46, %v1789_v43  ;;  %v641_v21 = vadd.f32 %v640_v30, %v639_v42 }
 0x125   : > { %1453 = vlog2.f32 %v623_v13  ;;  %v951_v44 = vrot.slane %v944_v9, %v1746_v20  ;;  %v974_v51 = vrot.slane %v967_v33, %v1746_v20  ;;  %v671_v22 = vadd.f32 %v1450_v40, %v670_v58  ;;  %v828_v33 = vld [vmem:[#allocation2] ss:$8 sm:$0x3] }
 0x126   : > { %v669_v56 = vadd.f32 %v668_v52, %v667_v49  ;;  %v1339_v62 = vsel %vm724_vm4, 1.0, %v1599_v0  ;;  %v636_v61 = vrot.slane %v635_v54, 1  ;;  %v686_v1 = vrot.slane %v685_v57, 2 }
 0x127   : > { %v958_v17 = vrot.slane %v951_v44, %v1746_v20  ;;  %v981_v15 = vrot.slane %v974_v51, %v1746_v20  ;;  %v741_v34 = vmul.f32 %v1339_v62, %v737_v23  ;;  %v672_v4 = vrot.slane %v671_v22, 2 }
 0x128   : > { %1455 = vlog2.f32 %v669_v56  ;;  %v690_v5 = vrot.slane %v1851_v59, 4  ;;  %v642_v11 = vrot.slane %v641_v21, 1  ;;  %v637_v14 = vadd.f32 %v636_v61, %v635_v54 }
 0x129   : > { %v960_v60 = vadd.f32 %v958_v17, %v941_v63  ;;  %v983_v2 = vadd.f32 %v981_v15, %v964_v41  ;;  %v901_v7 = vcombine.low %v740_v19, %v741_v34  ;;  %v673_v8 = vadd.f32 %v672_v4, %v671_v22  ;;  %v855_v17 = vld [vmem:[#allocation2 + $0x1] ss:$8 sm:$0x3]  ;;  %v1013_v15 = vld [vmem:[#allocation2 + $0x11] ss:$8 sm:$0x3] }
 0x12a   : > { %v687_v16 = vadd.f32 %v686_v1, %v685_v57  ;;  %v691_v29 = vadd.f32 %v690_v5, %v1851_v59  ;;  %v643_v24 = vadd.f32 %v642_v11, %v641_v21 }
 0x12b   : > { %961 = vst.msk [vmem:[#allocation2 + $0x5] ss:$8 sm:$0x3] %vm1764_vm5, %v960_v60  ;;  %984 = vst.msk [vmem:[#allocation2 + $0x6] ss:$8 sm:$0x3] %vm1764_vm5, %v983_v2  ;;  %v908_v0 = vrot.slane %v901_v7, %v1746_v20 }
 0x12c   : > { %v674_v18 = vrot.slane %v673_v8, 1  ;;  %v688_v37 = vrot.slane %v687_v16, 1  ;;  %v692_v49 = vrot.slane %v691_v29, 2 }
 0x12d   : > { %v915_v55 = vrot.slane %v908_v0, %v1746_v20 }
 0x12e   : > { %v1452_v43 = vpop.eup %1451  ;;  %v675_v42 = vadd.f32 %v674_v18, %v673_v8  ;;  %v689_v23 = vadd.f32 %v688_v37, %v687_v16 }
 0x12f   : > { %v625_v10 = vmul.f32 0.6931472, %v1452_v43  ;;  %v1454_v3 = vpop.eup %1453  ;;  %v917_v13 = vadd.f32 %v915_v55, %v898_v25 }
 0x130   : > { %v627_v19 = vmul.f32 0.6931472, %v1454_v3  ;;  %1457 = vlog2.f32 %v675_v42 }
 0x131   : > { %v628_v28 = vadd.f32 %v625_v10, %v1837_v31  ;;  %918 = vst.msk [vmem:[#allocation2 + $0x3] ss:$8 sm:$0x3] %vm1764_vm5, %v917_v13 }
 0x132   : > { %v629_v36 = vadd.f32 %v627_v19, %v1846_v38  ;;  %v1456_v39 = vpop.eup %1455  ;;  %v693_v38 = vadd.f32 %v692_v49, %v691_v29 }
 0x133   : > { %v644_v35 = vsub.f32 %v628_v28, %v637_v14  ;;  %v677_v31 = vmul.f32 0.6931472, %v1456_v39 }
 0x134   : > { %v645_v47 = vsub.f32 %v629_v36, %v643_v24  ;;  %v694_v58 = vrot.slane %v693_v38, 1 }
 0x135   : > { %v796_v45 = vmul.f32 %v1801_v53, %v644_v35  ;;  %v680_v50 = vadd.f32 %v677_v31, %v1860_v48 }
 0x136   : > { %v797_v59 = vmul.f32 %v1823_v12, %v645_v47  ;;  %v695_v51 = vadd.f32 %v694_v58, %v693_v38 }
 0x137   : > { %v696_v40 = vsub.f32 %v680_v50, %v689_v23 }
 0x138   : > { %v831_v30 = vcombine.low %v796_v45, %v797_v59 }
 0x139   : > { %v798_v52 = vmul.f32 %v1801_v53, %v696_v40  ;;  %v826_v54 = vmul.f32 %v1818_v6, %v696_v40 }
 0x13a   : > { %v838_v9 = vrot.slane %v831_v30, %v1746_v20  ;;  %v1458_v46 = vpop.eup %1457 }
 0x13b   : > { %v679_v44 = vmul.f32 0.6931472, %v1458_v46 }
 0x13c   : > { %v845_v57 = vrot.slane %v838_v9, %v1746_v20 }
 0x13d   : > { %v681_v48 = vadd.f32 %v679_v44, %v1882_v26 }
 0x13e   : > { %v847_v63 = vadd.f32 %v845_v57, %v828_v33 }
 0x13f   : > { %v697_v56 = vsub.f32 %v681_v48, %v695_v51 }
 0x140   : > { %852 = vst.msk [vmem:[#allocation2] ss:$8 sm:$0x3] %vm1764_vm5, %v847_v63 }
 0x141   : > { %v799_v21 = vmul.f32 %v1823_v12, %v697_v56  ;;  %v827_v41 = vmul.f32 %v1832_v27, %v697_v56 }
 0x143   : > { %v858_v53 = vcombine.low %v798_v52, %v799_v21  ;;  %v1016_v22 = vcombine.low %v826_v54, %v827_v41 }
 0x145   : > { %v865_v6 = vrot.slane %v858_v53, %v1746_v20  ;;  %v1023_v62 = vrot.slane %v1016_v22, %v1746_v20 }
 0x147   : > { %v872_v34 = vrot.slane %v865_v6, %v1746_v20  ;;  %v1030_v26 = vrot.slane %v1023_v62, %v1746_v20 }
 0x149   : > { %v874_v61 = vadd.f32 %v872_v34, %v855_v17  ;;  %v1032_v12 = vadd.f32 %v1030_v26, %v1013_v15 }
 0x14b   : > { %875 = vst.msk [vmem:[#allocation2 + $0x1] ss:$8 sm:$0x3] %vm1764_vm5, %v874_v61  ;;  %1033 = vst.msk [vmem:[#allocation2 + $0x11] ss:$8 sm:$0x3] %vm1764_vm5, %v1032_v12 }
 0x152   : > { %v1063_v27 = vld [vmem:[#allocation2 + $0x10] sm:$0xff]  ;;  %v1064_v1 = vld [vmem:[#allocation2 + $0x18] sm:$0xff]  ;;  %v1061_v4 = vld [vmem:[#allocation2] sm:$0xff] }
 0x153   : > { %v1068_v60 = vadd.f32 %v1064_v1, %v1063_v27  ;;  %v1062_v2 = vld [vmem:[#allocation2 + $0x8] sm:$0xff] }
 0x154   : > { %v1065_v5 = vadd.f32 %v1062_v2, %v1061_v4 }
 0x155   : > { %1069 = vadd.xlane.f32.xlu0 %v1068_v60 }
 0x156   : > { %1066 = vadd.xlane.f32.xlu1 %v1065_v5 }
 0x157   : > { %1472 = shalt.err (!%p1469_p5)
}
 0x158   : > { %s1473_s12 = scalar_lea.hbm %s1957_s30, 128  ;;  %s1477_s23 = scalar_lea.hbm %s2068_s6, 256 }
 0x159   : > { %p1474_p6 = scmp.ne.s32.totalorder %s1957_s30, %s1473_s12  ;;  %p1478_p10 = scmp.lt.u32.totalorder %s1957_s30, %s2068_s6 }
 0x15a   : > { %p1479_p11 = scmp.lt.u32.totalorder %s1477_s23, %s1473_s12  ;;  %p1481_p13 = scmp.lt.u32.totalorder %s1473_s12, %s1957_s30 }
 0x15b   : > { %p1475_p7 = pnand %p1474_p6, %p1689_p4 }
 0x15c   : > { %p1480_p12 = por %p1479_p11, %p1478_p10 }
 0x15d   : > { %p1476_p9 = pneg %p1475_p7 }
 0x15e   : > { %p1482_p0 = por %p1481_p13, %p1480_p12 }
 0x160   : > { %p1483_p1 = pnand %p1482_p0, %p1476_p9 }
 0x162   : > { %1486 = shalt.err (!%p1483_p1)
}
 0x163   : > { %1362 = dma.vmem_to_hbm [thread:$0]  (%p1689_p4), %s1119_s8, 128, %s1957_s30, %s1079_s20  }
 0x164   : > { %s2084_s21 = sshll.u32 %s1589_s27, 7  ;;  %s1101_s12 = sshll.u32 %s1855_s10, 4  ;;  %s1102_s12 = int_to_ptr.vmem [resolvable:$true] %s1101_s12 }
 0x165   : > { %s1985_s19 = scalar_lea.hbm %s2067_s5, %s2084_s21  ;;  %s1074_s15 = scalar_lea.sflag [#allocation4], %s1829_s22 }
 0x166   : > { %s1487_s23 = scalar_lea.vmem %s1102_s12, 128  ;;  %s1603_s0 = smov [#allocation3]  }
 0x167   : > { %p1488_p2 = scmp.ne.s32.totalorder %s1102_s12, %s1487_s23  ;;  %s1491_s1 = sshll.u32 %s1603_s0, 4  ;;  %s1492_s1 = int_to_ptr.vmem [resolvable:$false] %s1491_s1 }
 0x168   : > { %s1493_s2 = scalar_lea.vmem %s1492_s1, 256  ;;  %p1494_p6 = scmp.lt.s32.totalorder %s1102_s12, %s1492_s1 }
 0x169   : > { %p1489_p3 = pnand %p1488_p2, %p1689_p4  ;;  %p1495_p7 = scmp.lt.s32.totalorder %s1493_s2, %s1487_s23 }
 0x16b   : > { %p1490_p5 = pneg %p1489_p3  ;;  %p1496_p9 = por %p1495_p7, %p1494_p6 }
 0x16d   : > { %p1497_p10 = pnand %p1496_p9, %p1490_p5 }
 0x16f   : > { %1500 = shalt.err (!%p1497_p10)
}
 0x170   : > { %s1501_s10 = scalar_lea.hbm %s1985_s19, 128  ;;  %s1505_s21 = scalar_lea.hbm %s2067_s5, 256 }
 0x171   : > { %p1502_p11 = scmp.ne.s32.totalorder %s1985_s19, %s1501_s10  ;;  %p1506_p0 = scmp.lt.u32.totalorder %s1985_s19, %s2067_s5 }
 0x172   : > { %p1507_p1 = scmp.lt.u32.totalorder %s1505_s21, %s1501_s10  ;;  %p1509_p3 = scmp.lt.u32.totalorder %s1501_s10, %s1985_s19 }
 0x173   : > { %p1503_p12 = pnand %p1502_p11, %p1689_p4 }
 0x174   : > { %p1508_p2 = por %p1507_p1, %p1506_p0 }
 0x175   : > { %p1504_p13 = pneg %p1503_p12 }
 0x176   : > { %p1510_p5 = por %p1509_p3, %p1508_p2 }
 0x178   : > { %p1511_p6 = pnand %p1510_p5, %p1504_p13 }
 0x17a   : > { %1514 = shalt.err (!%p1511_p6)
}
 0x17b   : > { %1361 = dma.vmem_to_hbm [thread:$0]  (%p1689_p4), %s1102_s12, 128, %s1985_s19, %s1074_s15  }
 0x17c   : > { %s1321_s2 = sshll.u32 %s1829_s22, 4  ;;  %s1358_s0 = sshll.u32 %s1589_s27, 8 }
 0x17d   : > { %s392_s18 = scalar_lea.vmem [#allocation7], %s1321_s2  ;;  %s2013_s10 = scalar_lea.hbm %s2069_s7, %s1358_s0 }
 0x17e   : > { %s1133_s23 = sshll.u32 %s392_s18, 4  ;;  %s1604_s27 = smov [#allocation7]   ;;  %s2008_s23 = int_to_ptr.vmem [resolvable:$true] %s1133_s23 }
 0x17f   : > { %s1515_s21 = scalar_lea.vmem %s2008_s23, 256  ;;  %s1519_s22 = sshll.u32 %s1604_s27, 4  ;;  %s1520_s22 = int_to_ptr.vmem [resolvable:$false] %s1519_s22 }
 0x180   : > { %p1516_p7 = scmp.ne.s32.totalorder %s2008_s23, %s1515_s21  ;;  %s1521_s19 = scalar_lea.vmem %s1520_s22, 512 }
 0x181   : > { %p1522_p11 = scmp.lt.s32.totalorder %s2008_s23, %s1520_s22  ;;  %p1523_p12 = scmp.lt.s32.totalorder %s1521_s19, %s1515_s21 }
 0x182   : > { %p1517_p9 = pnand %p1516_p7, %p1689_p4 }
 0x183   : > { %p1524_p13 = por %p1523_p12, %p1522_p11 }
 0x184   : > { %p1518_p10 = pneg %p1517_p9 }
 0x186   : > { %p1525_p0 = pnand %p1524_p13, %p1518_p10 }
 0x1e2   : > { %v1070_v20 = vpop.xlane.xlu0 %1069 }
 0x1e3   : > { %1072 = vst [vmem:[%s392_s18 + $0x8] sm:$0xff] %v1070_v20  ;;  %v1067_v32 = vpop.xlane.xlu1 %1066 }
 0x1e4   : > { %1071 = vst [vmem:[%s392_s18] sm:$0xff] %v1067_v32 }
 0x1e5   : > { %1528 = shalt.err (!%p1525_p0)
}
 0x1e6   : > { %s1529_s12 = scalar_lea.hbm %s2013_s10, 256  ;;  %s1533_s1 = scalar_lea.hbm %s2069_s7, 512 }
 0x1e7   : > { %p1530_p1 = scmp.ne.s32.totalorder %s2013_s10, %s1529_s12  ;;  %p1534_p5 = scmp.lt.u32.totalorder %s2013_s10, %s2069_s7 }
 0x1e8   : > { %p1535_p6 = scmp.lt.u32.totalorder %s1533_s1, %s1529_s12  ;;  %p1537_p9 = scmp.lt.u32.totalorder %s1529_s12, %s2013_s10 }
 0x1e9   : > { %p1531_p2 = pnand %p1530_p1, %p1689_p4 }
 0x1ea   : > { %p1536_p7 = por %p1535_p6, %p1534_p5 }
 0x1eb   : > { %p1532_p3 = pneg %p1531_p2 }
 0x1ec   : > { %p1538_p10 = por %p1537_p9, %p1536_p7 }
 0x1ee   : > { %p1539_p11 = pnand %p1538_p10, %p1532_p3 }
 0x1f0   : > { %1542 = shalt.err (!%p1539_p11)
}
 0x1f1   : > { %s1605_s0 = smov 128   ;;  %s1606_s30 = smov 8  }
 0x1f2   : > { %1363 = dma.vmem_to_hbm [thread:$0]  (%p1689_p4), %s2008_s23, 256, %s2013_s10, %s1079_s20, %s1605_s0, %s1605_s0, %s1606_s30  }
 0x1f3 PF: > { %p1377_p12 = scmp.ge.s32.totalorder %s1597_s29, 2  ;;  %s1148_s8 = sand.u32 1, %s1577_s24  }
 0x1f4   : > { %s1149_s21 = scalar_lea.sflag [#allocation4], %s1148_s8 }
 0x1f5   : > { %p1368_p13 = pnand %p1377_p12, %p1698_p8 }
 0x1f7   : > { %1568 = dma.done.wait (!%p1368_p13), %s1149_s21, 128  }
 0x1f8   : > { %1570 = vsyncadd (!%p1368_p13), %s1149_s21, 4294967168  ;;  %s2085_s27 = sadd.s32 4294967294, %s1597_s29  }
 0x1f9   : > { %s1157_s22 = sand.u32 1, %s2085_s27  }
 0x1fa   : > { %s1158_s19 = scalar_lea.sflag [#allocation6], %s1157_s22 }
 0x1fb   : > { %1572 = dma.done.wait (!%p1368_p13), %s1158_s19, 384  }
 0x1fc   : > { %1574 = vsyncadd (!%p1368_p13), %s1158_s19, 4294966912  ;;  %s24_s29 = sadd.s32 1, %s1597_s29   ;;  %s2086_s24 = smov %s1581_s25 }
 0x1fd   : > { %p21_p4 = scmp.ge.s32.totalorder %s24_s29, 4   ;;  %s2087_s25 = smov %s1585_s26 }
 0x1fe   : > { %s2088_s26 = smov %s1704_s14  ;;  %s2089_s27 = smov %s1593_s28 }
 0x1ff   : > { %s2090_s28 = smov %s2092_s9  ;;  %23 = sbr.rel (!%p21_p4) target bundleno = 10 (0xa), region = 131 }
 0x206   :  { %1172 = vsyncpa [#allocation4], 1 }
 0x207   :  { %1174 = vsyncpa [#allocation4 + $0x1], 1 }
 0x208   :  { %1175 = vsyncpa [#allocation6], 1 }
 0x209   :  { %1177 = vsyncpa [#allocation6 + $0x1], 1 }

</bundles_post_ra>
